<compile_context>
chip_gen: v5e
topology: v5e:2x2
jax: 0.10.0
libtpu: 0.0.40
codegen_flags: <defaults>
</compile_context>

<pallas_src>
import functools

import jax
import jax.numpy as jnp
from jax.experimental import pallas as pl
from jax.experimental.pallas import tpu as pltpu


def _round_up(x, m):
    return ((x + m - 1) // m) * m


def _geometry(num_train, bit, n_class, tile_n, num_splits):
    c_pad = _round_up(n_class, 8)                 # Y rows, sublane-aligned
    k_pad = c_pad + _round_up(bit, 8)             # + U rows, sublane-aligned
    tile = max(128, (tile_n // 128) * 128)        # lane-aligned tile
    tile = min(tile, _round_up(-(-num_train // num_splits), 128))
    steps = -(-num_train // (num_splits * tile))
    n_pad = num_splits * steps * tile
    return c_pad, k_pad, tile, steps, n_pad


def _default_num_splits():
    # 2-way "parallel" leading axis only pays off on dual-TensorCore chips
    # (v7x); on 1-TC chips (v5e/v6e) the second split is a serial re-run.
    try:
        kind = jax.devices()[0].device_kind.lower()
    except Exception:
        return 1
    return 2 if "v7" in kind else 1


def idhn_init_state(num_train, bit, n_class, *, tile_n=4096, num_splits=None):
    """Fused, transposed, pre-padded [Y^T ; U^T] module state (lane-dense)."""
    if num_splits is None:
        num_splits = _default_num_splits()
    _, k_pad, _, _, n_pad = _geometry(num_train, bit, n_class, tile_n, num_splits)
    return jnp.zeros((k_pad, n_pad), jnp.float32)


def _idhn_kernel(lhs_ref, ynq_ref, R_ref, out_ref, acc_ref, *, q, batch, c_pad):
    j = pl.program_id(1)   # tile index inside this split ("arbitrary" axis)

    @pl.when(j == 0)
    def _():
        acc_ref[...] = jnp.zeros_like(acc_ref)

    R = R_ref[...]                                            # (K_pad, tile_n)

    # One fused MXU op per tile:
    #   lhs = [[y, 0], [0, (5/q)u]]  (2B, K_pad),  R = [Y^T ; U^T] (K_pad, tile_n)
    # rows 0..B-1 of the product = y @ Y_tile^T, rows B..2B-1 = (5/q) u @ U_tile^T
    su = jnp.dot(lhs_ref[...], R, preferred_element_type=jnp.float32)  # (2B, tile_n)
    s_raw = su[:batch, :]
    ip = su[batch:, :]

    # database row norms from the Y rows of the same streamed tile
    # (pad rows are zero -> exact; XLU reduce + EUP sqrt ride in free slots)
    y_part = R[:c_pad, :]
    ynorm = jnp.sqrt(jnp.sum(y_part * y_part, axis=0, keepdims=True))  # (1, tile_n)
    norm = ynq_ref[...] * ynorm                                        # (B, tile_n)
    s = s_raw / (norm + 1e-5)
    # TODO(synk): if a v7x profile shows VALU as the binding slot, switch to
    # s_raw * pl.reciprocal(norm + 1e-5, approx=True) behind a tolerance gate.

    M = jnp.where((s > 0.99) | (s < 0.01), 1.0, 0.0)
    log_loss = jnp.log(1.0 + jnp.exp(-jnp.abs(ip))) + jnp.maximum(ip, 0.0) - s * ip
    mse_loss = (ip + q - 2.0 * q * s) ** 2

    # no per-step validity mask: padded zero columns contribute exactly
    # B*log(2) each and are corrected once in the wrapper
    acc_ref[...] += M * log_loss + 0.1 * (1.0 - M) * mse_loss

    @pl.when(j == pl.num_programs(1) - 1)
    def _():
        out_ref[0, 0] = jnp.sum(acc_ref[...])     # single XLU reduce per split


@functools.partial(jax.jit,
                   static_argnames=("q", "num_train", "tile_n", "num_splits"),
                   donate_argnums=(3,))
def _idhn_loss_impl(u_raw, y, ind, R_state, *, q, num_train, tile_n, num_splits):
    B, bit = u_raw.shape
    _, C = y.shape
    c_pad, k_pad, tile, steps, n_pad = _geometry(num_train, bit, C, tile_n, num_splits)
    assert B % 8 == 0, "batch must be a multiple of 8 (sublane alignment)"
    assert R_state.shape == (k_pad, n_pad), "state built with different geometry"

    # --- glue (plain JAX, all O(B)): normalise + in-place column scatter -----
    u = u_raw / (jnp.abs(u_raw) + 1.0)                      # u = u / (|u| + 1)
    yf = y.astype(jnp.float32)
    cols = jnp.zeros((k_pad, B), jnp.float32)
    cols = cols.at[:C, :].set(yf.T)                         # Y[ind, :] = y
    cols = cols.at[c_pad:c_pad + bit, :].set(u.T)           # U[ind, :] = u
    R = R_state.at[:, ind].set(cols)                        # donated -> in place

    ynq = jnp.sqrt(jnp.sum(yf * yf, axis=1, keepdims=True))             # (B, 1)
    lhs = jnp.zeros((2 * B, k_pad), jnp.float32)
    lhs = lhs.at[:B, :C].set(yf)
    lhs = lhs.at[B:, c_pad:c_pad + bit].set((5.0 / q) * u)
    # TODO(synk): optional bf16 storage of the streamed slab (v5e/v6e byte
    # reduction) is accuracy-gated vs the 1e-4 tolerance, so kept f32 here.

    kernel = functools.partial(_idhn_kernel, q=float(q), batch=B, c_pad=c_pad)
    cost = pl.CostEstimate(
        flops=2 * (2 * B) * k_pad * n_pad,
        transcendentals=3 * B * n_pad,
        bytes_accessed=(k_pad * n_pad + 2 * B * k_pad + B) * 4,
    )

    partials = pl.pallas_call(
        kernel,
        out_shape=jax.ShapeDtypeStruct((num_splits, 1), jnp.float32),
        grid=(num_splits, steps),
        in_specs=[
            pl.BlockSpec((2 * B, k_pad), lambda i, j: (0, 0)),   # fused LHS (resident)
            pl.BlockSpec((B, 1), lambda i, j: (0, 0)),           # query row norms (resident)
            pl.BlockSpec((k_pad, tile),
                         lambda i, j: (0, i * steps + j)),       # lane-dense [Y^T;U^T] tile
        ],
        out_specs=pl.BlockSpec((1, 1), lambda i, j: (i, 0),
                               memory_space=pltpu.MemorySpace.SMEM),
        scratch_shapes=[pltpu.VMEM((B, tile), jnp.float32)],
        compiler_params=pltpu.CompilerParams(
            dimension_semantics=("parallel", "arbitrary")),
        cost_estimate=cost,
    )(lhs, ynq, R)

    # finalize in the wrapper: per-core partials stay additive; padded zero
    # columns each contributed exactly B*log(2) (M=1, ip=0) -> subtract once.
    pad_cols = n_pad - num_train
    total = jnp.sum(partials) - jnp.float32(pad_cols * B) * jnp.log(jnp.float32(2.0))
    loss1 = total / jnp.float32(B * num_train)
    loss2 = 0.1 * jnp.mean(jnp.abs(jnp.abs(u) - 1.0))
    return loss1 + loss2, R


def idhn_loss_pallas(u_raw, y, ind, R_state, *, q, num_train,
                     tile_n=4096, num_splits=None):
    if num_splits is None:
        num_splits = _default_num_splits()
    return _idhn_loss_impl(u_raw, y, ind, R_state, q=q, num_train=num_train,
                           tile_n=tile_n, num_splits=num_splits)


def idhn_loss_ref(u_raw, y, ind, U_state, Y_state, q):
    # Pure-JAX reference mirroring the PyTorch forward exactly.
    u = u_raw / (jnp.abs(u_raw) + 1.0)
    y = y.astype(jnp.float32)
    U = U_state.at[ind].set(u)
    Y = Y_state.at[ind].set(y)
    s = y @ Y.T
    norm = jnp.sqrt(jnp.sum(y ** 2, axis=1, keepdims=True)) @ \
           jnp.sqrt(jnp.sum(Y ** 2, axis=1, keepdims=True)).T
    s = s / (norm + 1e-5)
    M = (s > 0.99).astype(jnp.float32) + (s < 0.01).astype(jnp.float32)
    ip = 5.0 / q * (u @ U.T)
    log_loss = jnp.log(1.0 + jnp.exp(-jnp.abs(ip))) + jnp.maximum(ip, 0.0) - s * ip
    mse_loss = (ip + q - 2.0 * s * q) ** 2
    loss1 = jnp.mean(M * log_loss + 0.1 * (1.0 - M) * mse_loss)
    loss2 = 0.1 * jnp.mean(jnp.abs(jnp.abs(u) - 1.0))
    return loss1 + loss2


if __name__ == "__main__":
    # small shapes consistent with the module:
    #   batch B=8, bit (q)=32, n_class=16, num_train=200 (exercises padding)
    B, bit, n_class, num_train = 8, 32, 16, 200

    key = jax.random.PRNGKey(0)
    k_u, k_y = jax.random.split(key)
    u_raw = 2.0 * jax.random.normal(k_u, (B, bit), dtype=jnp.float32)      # net output codes
    y = (jax.random.uniform(k_y, (B, n_class)) < 0.3).astype(jnp.float32)  # multi-hot labels
    ind = jnp.array([3, 17, 42, 55, 64, 77, 90, 120], dtype=jnp.int32)

    num_splits = _default_num_splits()
    # module state (torch.zeros(num_train, bit) / torch.zeros(num_train, n_class))
    # kept as one fused, transposed, pre-padded slab [Y^T ; U^T]:
    R_state = idhn_init_state(num_train, bit, n_class, num_splits=num_splits)

    # reference first (pure JAX, fresh zero U/Y buffers)
    U0 = jnp.zeros((num_train, bit), jnp.float32)
    Y0 = jnp.zeros((num_train, n_class), jnp.float32)
    ref = jax.block_until_ready(idhn_loss_ref(u_raw, y, ind, U0, Y0, q=bit))

    loss, R_new = idhn_loss_pallas(u_raw, y, ind, R_state, q=bit,
                                   num_train=num_train, num_splits=num_splits)
    loss = jax.block_until_ready(loss)

    assert jnp.allclose(loss, ref, rtol=1e-4, atol=1e-5), (loss, ref)
    print("KERNEL_OK")
</pallas_src>

<mosaic_0001>
module attributes {stable_mosaic.version = 11 : i64} {
  func.func @_idhn_kernel(%arg0: i32, %arg1: i32, %arg2: memref<16x48xf32, #tpu.memory_space<vmem>>, %arg3: memref<8x1xf32, #tpu.memory_space<vmem>>, %arg4: memref<48x256xf32, #tpu.memory_space<vmem>>, %arg5: memref<1x1xf32, #tpu.memory_space<smem>>, %arg6: memref<8x256xf32, #tpu.memory_space<vmem>>) attributes {dimension_semantics = [#tpu.dimension_semantics<parallel>, #tpu.dimension_semantics<arbitrary>], iteration_bounds = array<i64: 1, 1>, scalar_prefetch = 0 : i64, scratch_operands = 1 : i64, tpu.core_type = #tpu.core_type<tc>, window_params = [{pipeline_mode = #tpu.pipeline_mode<synchronous>, transform_indices = @transform_0, window_bounds = array<i64: 16, 48>}, {pipeline_mode = #tpu.pipeline_mode<synchronous>, transform_indices = @transform_1, window_bounds = array<i64: 8, 1>}, {transform_indices = @transform_2, window_bounds = array<i64: 48, 256>}, {transform_indices = @transform_3, window_bounds = array<i64: 1, 1>}]} {
    %c0_i32 = arith.constant 0 : i32
    %0 = arith.cmpi eq, %arg1, %c0_i32 : i32
    %1 = arith.extui %0 : i1 to i32
    %c0_i32_0 = arith.constant 0 : i32
    %2 = arith.cmpi ne, %1, %c0_i32_0 : i32
    scf.if %2 {
      %cst_25 = arith.constant 0.000000e+00 : f32
      %59 = vector.broadcast %cst_25 : f32 to vector<8x256xf32>
      %c0_26 = arith.constant 0 : index
      %c0_27 = arith.constant 0 : index
      %60 = vector.load %arg6[%c0_26, %c0_27] : memref<8x256xf32, #tpu.memory_space<vmem>>, vector<8x256xf32>
      tpu.vector_store %arg6[%c0_26, %c0_27], %59 {strides = array<i32>} : memref<8x256xf32, #tpu.memory_space<vmem>>, vector<8x256xf32>,
    } else {
    }
    %c0 = arith.constant 0 : index
    %c0_1 = arith.constant 0 : index
    %3 = vector.load %arg4[%c0, %c0_1] : memref<48x256xf32, #tpu.memory_space<vmem>>, vector<48x256xf32>
    %c0_2 = arith.constant 0 : index
    %c0_3 = arith.constant 0 : index
    %4 = vector.load %arg2[%c0_2, %c0_3] : memref<16x48xf32, #tpu.memory_space<vmem>>, vector<16x48xf32>
    %cst = arith.constant dense<0.000000e+00> : vector<16x256xf32>
    %5 = tpu.matmul %4, %3, %cst {dimension_numbers = #tpu.dot_dimension_numbers<[1], [0], [0], [1], [0, 0, 1, 1], [], []>} : vector<16x48xf32>, vector<48x256xf32>, vector<16x256xf32> -> vector<16x256xf32>
    %6 = vector.extract_strided_slice %5 {offsets = [0, 0], sizes = [8, 256], strides = [1, 1]} : vector<16x256xf32> to vector<8x256xf32>
    %7 = vector.extract_strided_slice %5 {offsets = [8, 0], sizes = [8, 256], strides = [1, 1]} : vector<16x256xf32> to vector<8x256xf32>
    %8 = vector.extract_strided_slice %3 {offsets = [0, 0], sizes = [16, 256], strides = [1, 1]} : vector<48x256xf32> to vector<16x256xf32>
    %9 = arith.mulf %8, %8 : vector<16x256xf32>
    %cst_4 = arith.constant dense<0.000000e+00> : vector<256xf32>
    %10 = vector.multi_reduction <add>, %9, %cst_4 [0] : vector<16x256xf32> to vector<256xf32>
    %11 = vector.shape_cast %10 : vector<256xf32> to vector<1x256xf32>
    %12 = math.sqrt %11 : vector<1x256xf32>
    %c0_5 = arith.constant 0 : index
    %c0_6 = arith.constant 0 : index
    %13 = vector.load %arg3[%c0_5, %c0_6] : memref<8x1xf32, #tpu.memory_space<vmem>>, vector<8x1xf32>
    %14 = vector.broadcast %13 : vector<8x1xf32> to vector<8x256xf32>
    %15 = vector.broadcast %12 : vector<1x256xf32> to vector<8x256xf32>
    %16 = arith.mulf %14, %15 : vector<8x256xf32>
    %cst_7 = arith.constant 9.99999974E-6 : f32
    %17 = vector.broadcast %cst_7 : f32 to vector<8x256xf32>
    %18 = arith.addf %16, %17 : vector<8x256xf32>
    %19 = arith.divf %6, %18 : vector<8x256xf32>
    %cst_8 = arith.constant 9.900000e-01 : f32
    %20 = vector.broadcast %cst_8 : f32 to vector<8x256xf32>
    %21 = arith.cmpf ogt, %19, %20 : vector<8x256xf32>
    %cst_9 = arith.constant 0.00999999977 : f32
    %22 = vector.broadcast %cst_9 : f32 to vector<8x256xf32>
    %23 = arith.cmpf olt, %19, %22 : vector<8x256xf32>
    %24 = arith.ori %21, %23 : vector<8x256xi1>
    %cst_10 = arith.constant 1.000000e+00 : f32
    %cst_11 = arith.constant 0.000000e+00 : f32
    %25 = vector.broadcast %cst_10 : f32 to vector<8x256xf32>
    %26 = vector.broadcast %cst_11 : f32 to vector<8x256xf32>
    %27 = arith.select %24, %25, %26 : vector<8x256xi1>, vector<8x256xf32>
    %28 = math.absf %7 : vector<8x256xf32>
    %cst_12 = arith.constant 0.000000e+00 : f32
    %29 = vector.broadcast %cst_12 : f32 to vector<8x256xf32>
    %30 = arith.subf %29, %28 : vector<8x256xf32>
    %31 = math.exp %30 : vector<8x256xf32>
    %cst_13 = arith.constant 1.000000e+00 : f32
    %32 = vector.broadcast %cst_13 : f32 to vector<8x256xf32>
    %33 = arith.addf %32, %31 : vector<8x256xf32>
    %34 = math.log %33 : vector<8x256xf32>
    %cst_14 = arith.constant 0.000000e+00 : f32
    %35 = vector.broadcast %cst_14 : f32 to vector<8x256xf32>
    %36 = arith.maximumf %7, %35 : vector<8x256xf32>
    %37 = arith.addf %34, %36 : vector<8x256xf32>
    %38 = arith.mulf %19, %7 : vector<8x256xf32>
    %39 = arith.subf %37, %38 : vector<8x256xf32>
    %cst_15 = arith.constant 3.200000e+01 : f32
    %40 = vector.broadcast %cst_15 : f32 to vector<8x256xf32>
    %41 = arith.addf %7, %40 : vector<8x256xf32>
    %cst_16 = arith.constant 6.400000e+01 : f32
    %42 = vector.broadcast %cst_16 : f32 to vector<8x256xf32>
    %43 = arith.mulf %42, %19 : vector<8x256xf32>
    %44 = arith.subf %41, %43 : vector<8x256xf32>
    %45 = arith.mulf %44, %44 : vector<8x256xf32>
    %c0_17 = arith.constant 0 : index
    %c0_18 = arith.constant 0 : index
    %46 = vector.load %arg6[%c0_17, %c0_18] : memref<8x256xf32, #tpu.memory_space<vmem>>, vector<8x256xf32>
    %47 = arith.mulf %27, %39 : vector<8x256xf32>
    %cst_19 = arith.constant 1.000000e+00 : f32
    %48 = vector.broadcast %cst_19 : f32 to vector<8x256xf32>
    %49 = arith.subf %48, %27 : vector<8x256xf32>
    %cst_20 = arith.constant 1.000000e-01 : f32
    %50 = vector.broadcast %cst_20 : f32 to vector<8x256xf32>
    %51 = arith.mulf %50, %49 : vector<8x256xf32>
    %52 = arith.mulf %51, %45 : vector<8x256xf32>
    %53 = arith.addf %47, %52 : vector<8x256xf32>
    %54 = arith.addf %46, %53 : vector<8x256xf32>
    %c0_21 = arith.constant 0 : index
    %c0_22 = arith.constant 0 : index
    %55 = vector.load %arg6[%c0_21, %c0_22] : memref<8x256xf32, #tpu.memory_space<vmem>>, vector<8x256xf32>
    tpu.vector_store %arg6[%c0_21, %c0_22], %54 {strides = array<i32>} : memref<8x256xf32, #tpu.memory_space<vmem>>, vector<8x256xf32>,
    %c0_i32_23 = arith.constant 0 : i32
    %56 = arith.cmpi eq, %arg1, %c0_i32_23 : i32
    %57 = arith.extui %56 : i1 to i32
    %c0_i32_24 = arith.constant 0 : i32
    %58 = arith.cmpi ne, %57, %c0_i32_24 : i32
    scf.if %58 {
      %c0_25 = arith.constant 0 : index
      %c0_26 = arith.constant 0 : index
      %59 = vector.load %arg6[%c0_25, %c0_26] : memref<8x256xf32, #tpu.memory_space<vmem>>, vector<8x256xf32>
      %60 = vector.shape_cast %59 : vector<8x256xf32> to vector<1x8x256xf32>
      %cst_27 = arith.constant dense<0.000000e+00> : vector<1xf32>
      %61 = vector.multi_reduction <add>, %60, %cst_27 [1, 2] : vector<1x8x256xf32> to vector<1xf32>
      %62 = vector.shape_cast %61 : vector<1xf32> to vector<1x1x1xf32>
      %63 = vector.extract %62[0, 0, 0] : f32 from vector<1x1x1xf32>
      %c0_28 = arith.constant 0 : index
      %c0_29 = arith.constant 0 : index
      %64 = memref.load %arg5[%c0_28, %c0_29] : memref<1x1xf32, #tpu.memory_space<smem>>
      memref.store %63, %arg5[%c0_28, %c0_29] : memref<1x1xf32, #tpu.memory_space<smem>>
    } else {
    }
    return
  }
  func.func @transform_0(%arg0: i32, %arg1: i32) -> (i32, i32) {
    %c0_i32 = arith.constant 0 : i32
    %c0_i32_0 = arith.constant 0 : i32
    %c0_i32_1 = arith.constant 0 : i32
    return %c0_i32, %c0_i32_0 : i32, i32
  }
  func.func @transform_1(%arg0: i32, %arg1: i32) -> (i32, i32) {
    %c0_i32 = arith.constant 0 : i32
    %c0_i32_0 = arith.constant 0 : i32
    %c0_i32_1 = arith.constant 0 : i32
    return %c0_i32, %c0_i32_0 : i32, i32
  }
  func.func @transform_2(%arg0: i32, %arg1: i32) -> (i32, i32) {
    %c1_i32 = arith.constant 1 : i32
    %0 = arith.muli %arg0, %c1_i32 : i32
    %1 = arith.addi %0, %arg1 : i32
    %c0_i32 = arith.constant 0 : i32
    %c0_i32_0 = arith.constant 0 : i32
    return %c0_i32, %1 : i32, i32
  }
  func.func @transform_3(%arg0: i32, %arg1: i32) -> (i32, i32) {
    %c0_i32 = arith.constant 0 : i32
    %c0_i32_0 = arith.constant 0 : i32
    return %arg0, %c0_i32 : i32, i32
  }
}

</mosaic_0001>

<bundles_post_ra>
// kernel: _idhn_loss_impl.1
= control target key start
LH: loop header
LB: loop body
LE: loop exit
PB: predicated region body
PF: predicated region fallthrough
CT: control target
= control target key end

     0   :  { %v336_v5 = vmov 0   ;;  %s419_s0 = inlined_call_operand.vmem [shape: f32[16,48], index: 0, kind: input, shape index: {}]   ;;  %s420_s1 = inlined_call_operand.vmem [shape: f32[8,1], index: 1, kind: input, shape index: {}]   ;;  %s421_s2 = inlined_call_operand.vmem [shape: f32[48,256], index: 2, kind: input, shape index: {}]   ;;  %s422_s3 = inlined_call_operand.hbm [shape: f32[1,1], index: 3, kind: output, shape index: {}]  }
   0x1   :  { %v53_v0 = vld [vmem:[%s421_s2 + $0x50] sm:$0xff]  ;;  %v54_v1 = vld [vmem:[%s421_s2 + $0x58] sm:$0xff]  ;;  %v51_v2 = vld [vmem:[%s421_s2 + $0x40] sm:$0xff]  ;;  %305 = vset.pattern.permute.xlu0 %v336_v5 }
   0x2   :  { %288 = vmatpush.msra.mxu2 %v53_v0  ;;  %294 = vmatpush.msra.mxu3 %v54_v1  ;;  %v52_v3 = vld [vmem:[%s421_s2 + $0x48] sm:$0xff]  ;;  %v152_v4 = vld [vmem:[%s420_s1] sm:$0xff]  ;;  %v49_v6 = vld [vmem:[%s421_s2 + $0x30] sm:$0xff] }
   0x3   :  { %74 = vmatpush.msra.mxu0 %v53_v0  ;;  %v50_v7 = vld [vmem:[%s421_s2 + $0x38] sm:$0xff]  ;;  %v45_v8 = vld [vmem:[%s421_s2 + $0x10] sm:$0xff]  ;;  %v43_v10 = vld [vmem:[%s421_s2] sm:$0xff]  ;;  %97 = vmatpush.msra.mxu1 %v54_v1 }
   0x4   :  { %289 = vmatpush.msra.mxu2 %v51_v2  ;;  %295 = vmatpush.msra.mxu3 %v52_v3  ;;  %v46_v9 = vld [vmem:[%s421_s2 + $0x18] sm:$0xff]  ;;  %v47_v11 = vld [vmem:[%s421_s2 + $0x20] sm:$0xff]  ;;  %v48_v12 = vld [vmem:[%s421_s2 + $0x28] sm:$0xff]  ;;  %v112_v13 = vmul.f32 %v45_v8, %v45_v8  ;;  %v110_v15 = vmul.f32 %v43_v10, %v43_v10 }
   0x5   :  { %155 = vperm.xlu0 %305, %v152_v4   ;;  %v113_v14 = vmul.f32 %v46_v9, %v46_v9  ;;  %v44_v16 = vld [vmem:[%s421_s2 + $0x8] sm:$0xff] }
   0x6   :  { %290 = vmatpush.msra.mxu2 %v49_v6  ;;  %296 = vmatpush.msra.mxu3 %v50_v7  ;;  %v111_v17 = vmul.f32 %v44_v16, %v44_v16 }
   0x7   :  { %8 = vsyncpa [#allocation4], 0  ;;  %75 = vmatpush.msra.mxu0 %v51_v2  ;;  %98 = vmatpush.msra.mxu1 %v52_v3  ;;  %v114_v18 = vadd.f32 %v112_v13, %v110_v15  ;;  %v56_v20 = vld [vmem:[%s419_s0 + $0x8] sm:$0xff]  ;;  %vm57_vm0 = vcmask 392192   ;;  %v55_v21 = vld [vmem:[%s419_s0] sm:$0xff]  ;;  %s268_s14 = sshll.u32 %s422_s3, 4  ;;  %s269_s14 = int_to_ptr.hbm [resolvable:$true] %s268_s14 }
   0x8   :  { %291 = vmatpush.msra.mxu2 %v47_v11  ;;  %297 = vmatpush.msra.mxu3 %v48_v12  ;;  %v121_v19 = vadd.f32 %v113_v14, %v111_v17  ;;  %s338_s16 = smov [#allocation3]  }
   0x9   :  { %76 = vmatpush.msra.mxu0 %v49_v6  ;;  %99 = vmatpush.msra.mxu1 %v50_v7  ;;  %v115_v22 = vrot.slane %v114_v18, 4 }
   0xa   :  { %292 = vmatpush.msra.mxu2 %v45_v8  ;;  %298 = vmatpush.msra.mxu3 %v46_v9  ;;  %v122_v23 = vrot.slane %v121_v19, 4 }
   0xb   :  { %77 = vmatpush.msra.mxu0 %v47_v11  ;;  %100 = vmatpush.msra.mxu1 %v48_v12  ;;  %v116_v24 = vadd.f32 %v115_v22, %v114_v18 }
   0xc   :  { %293 = vmatpush.msra.mxu2 %v43_v10  ;;  %299 = vmatpush.msra.mxu3 %v44_v16  ;;  %v123_v25 = vadd.f32 %v122_v23, %v121_v19 }
   0xd   :  { %78 = vmatpush.msra.mxu0 %v45_v8  ;;  %285 = vmatmul.msk.f32.vlgmr.msra.gmra.mxu2 %vm57_vm0, %v56_v20  ;;  %v117_v26 = vrot.slane %v116_v24, 2 }
   0xe   :  { %101 = vmatpush.msra.mxu1 %v46_v9  ;;  %287 = vmatmul.msk.f32.vlgmr.msra.gmra.mxu3 %vm57_vm0, %v56_v20  ;;  %v124_v27 = vrot.slane %v123_v25, 2 }
   0xf   :  { %79 = vmatpush.msra.mxu0 %v43_v10  ;;  %v118_v28 = vadd.f32 %v117_v26, %v116_v24 }
  0x10   :  { %102 = vmatpush.msra.mxu1 %v44_v16  ;;  %284 = vmatmul.msk.f32.vlgmr.msra.gmra.mxu0 %vm57_vm0, %v55_v21  ;;  %v125_v29 = vadd.f32 %v124_v27, %v123_v25 }
  0x11   :  { %286 = vmatmul.msk.f32.vlgmr.msra.gmra.mxu1 %vm57_vm0, %v55_v21  ;;  %v119_v30 = vrot.slane %v118_v28, 1 }
  0x12   :  { %v126_v31 = vrot.slane %v125_v29, 1 }
  0x13   :  { %v120_v32 = vadd.f32 %v119_v30, %v118_v28 }
  0x14   :  { %v127_v33 = vadd.f32 %v126_v31, %v125_v29 }
  0x15   :  { %306 = vrsqrt.f32 %v120_v32  ;;  %vm135_vm1 = vcmp.eq.f32.partialorder %v120_v32, inf  ;;  %v138_v48 = vand.u32 2147483648, %v120_v32  ;;  %vm137_vm3 = vcmp.eq.f32.partialorder %v120_v32, 0.0 }
  0x16   :  { %308 = vrsqrt.f32 %v127_v33  ;;  %vm147_vm2 = vcmp.eq.f32.partialorder %v127_v33, inf  ;;  %v150_v49 = vand.u32 2147483648, %v127_v33  ;;  %vm149_vm4 = vcmp.eq.f32.partialorder %v127_v33, 0.0 }
  0x1b   :  { %v307_v34 = vpop.eup %306 }
  0x1c   :  { %v309_v35 = vpop.eup %308  ;;  %v129_v36 = vmul.f32 %v307_v34, %v120_v32 }
  0x1d   :  { %v141_v37 = vmul.f32 %v309_v35, %v127_v33 }
  0x1e   :  { %v130_v38 = vmul.f32 %v307_v34, %v129_v36 }
  0x1f   :  { %v142_v39 = vmul.f32 %v309_v35, %v141_v37  ;;  %v337_v37 = vmov 0.0  }
  0x20   :  { %v131_v40 = vmul.f32 0.5, %v130_v38 }
  0x21   :  { %v143_v41 = vmul.f32 0.5, %v142_v39 }
  0x22   :  { %v132_v42 = vsub.f32 1.5, %v131_v40 }
  0x23   :  { %v144_v43 = vsub.f32 1.5, %v143_v41 }
  0x24   :  { %v133_v44 = vmul.f32 %v307_v34, %v132_v42 }
  0x25   :  { %v145_v45 = vmul.f32 %v309_v35, %v144_v43 }
  0x26   :  { %v134_v46 = vmul.f32 %v133_v44, %v120_v32 }
  0x27   :  { %v146_v47 = vmul.f32 %v145_v45, %v127_v33 }
  0x28   :  { %v136_v50 = vsel %vm135_vm1, %v120_v32, %v134_v46 }
  0x29   :  { %v148_v51 = vsel %vm147_vm2, %v127_v33, %v146_v47  ;;  %v139_v52 = vsel %vm137_vm3, %v138_v48, %v136_v50 }
  0x2a   :  { %v151_v53 = vsel %vm149_vm4, %v150_v49, %v148_v51 }
  0x77   :  { %v156_v54 = vpop.permute.xlu0 %155 }
  0x78   :  { %v158_v55 = vmul.f32 %v156_v54, %v139_v52  ;;  %v159_v56 = vmul.f32 %v156_v54, %v151_v53 }
  0x7a   :  { %v160_v57 = vadd.f32 1e-05, %v158_v55  ;;  %v161_v58 = vadd.f32 1e-05, %v159_v56 }
  0x7c   :  { %310 = vrcp.f32 %v160_v57  ;;  %vm167_vm5 = vweird.f32 %v160_v57  ;;  %v173_v3 = vand.u32 2147483648, %v160_v57  ;;  %vm182_vm7 = vweird.f32 %v161_v58 }
  0x7d   :  { %312 = vrcp.f32 %v161_v58  ;;  %v171_v5 = vand.u32 2147483647, %v160_v57  ;;  %v188_v6 = vand.u32 2147483648, %v161_v58  ;;  %v186_v9 = vand.u32 2147483647, %v161_v58 }
  0x7e   :  { %v174_v12 = vor.u32 1.1754944e-38, %v173_v3 }
  0x7f   :  { %vm172_vm11 = vcmp.eq.f32.partialorder %v171_v5, 8.507059e+37  ;;  %v189_v16 = vor.u32 1.1754944e-38, %v188_v6  ;;  %vm187_vm12 = vcmp.eq.f32.partialorder %v186_v9, 8.507059e+37 }
  0x82   :  { %v311_v59 = vpop.eup %310 }
  0x83   :  { %v313_v60 = vpop.eup %312  ;;  %v163_v61 = vmul.f32 %v311_v59, %v160_v57  ;;  %vm168_vm6 = vweird.f32 %v311_v59 }
  0x84   :  { %v178_v62 = vmul.f32 %v313_v60, %v161_v58  ;;  %vm183_vm8 = vweird.f32 %v313_v60  ;;  %vm404_vm9 = vmor %vm167_vm5, %vm168_vm6 }
  0x85   :  { %v164_v63 = vsub.f32 1.0, %v163_v61  ;;  %vm408_vm10 = vmor %vm182_vm7, %vm183_vm8 }
  0x86   :  { %v179_v0 = vsub.f32 1.0, %v178_v62 }
  0x87   :  { %v165_v1 = vmul.f32 %v311_v59, %v164_v63 }
  0x88   :  { %v180_v2 = vmul.f32 %v313_v60, %v179_v0 }
  0x89   :  { %v166_v4 = vadd.f32 %v311_v59, %v165_v1 }
  0x8a   :  { %v181_v8 = vadd.f32 %v313_v60, %v180_v2 }
  0x8b   :  { %v170_v15 = vsel %vm404_vm9, %v311_v59, %v166_v4 }
  0x8c   :  { %v185_v18 = vsel %vm408_vm10, %v313_v60, %v181_v8  ;;  %v175_v22 = vsel %vm172_vm11, %v174_v12, %v170_v15 }
  0x8d   :  { %v81_v21 = vpop.f32.mrf.mxu0  ;;  %v190_v25 = vsel %vm187_vm12, %v189_v16, %v185_v18 }
  0x8e   :  { %v104_v24 = vpop.f32.mrf.mxu1  ;;  %v176_v27 = vmul.f32 %v175_v22, %v81_v21 }
  0x8f   :  { %v191_v28 = vmul.f32 %v190_v25, %v104_v24 }
  0x90   :  { %v84_v11 = vpop.f32.mrf.mxu2  ;;  %vm192_vm13 = vcmp.gt.f32.partialorder %v176_v27, 0.99  ;;  %vm194_vm14 = vcmp.lt.f32.partialorder %v176_v27, 0.01  ;;  %v224_v34 = vmul.f32 64.0, %v176_v27 }
  0x91   :  { %v200_v13 = vand.u32 2147483647, %v84_v11  ;;  %v107_v14 = vpop.f32.mrf.mxu3  ;;  %vm193_vm15 = vcmp.gt.f32.partialorder %v191_v28, 0.99  ;;  %vm195_vm0 = vcmp.lt.f32.partialorder %v191_v28, 0.01  ;;  %vm196_vm1 = vmor %vm192_vm13, %vm194_vm14  ;;  %v218_v51 = vmul.f32 %v176_v27, %v84_v11 }
  0x92   :  { %v201_v17 = vand.u32 2147483647, %v107_v14  ;;  %vm197_vm2 = vmor %vm193_vm15, %vm195_vm0  ;;  %v222_v33 = vadd.f32 32.0, %v84_v11  ;;  %v223_v35 = vadd.f32 32.0, %v107_v14  ;;  %v225_v36 = vmul.f32 64.0, %v191_v28 }
  0x93   :  { %v202_v19 = vsub.f32 0.0, %v200_v13  ;;  %v198_v38 = vsel %vm196_vm1, 1.0, %v337_v37  ;;  %v199_v39 = vsel %vm197_vm2, 1.0, %v337_v37  ;;  %v214_v47 = vmax.f32 %v84_v11, 0.0 }
  0x94   :  { %v203_v20 = vsub.f32 0.0, %v201_v17  ;;  %v226_v40 = vsub.f32 %v222_v33, %v224_v34  ;;  %v234_v41 = vsub.f32 1.0, %v198_v38  ;;  %v227_v43 = vsub.f32 %v223_v35, %v225_v36 }
  0x95   :  { %v204_v23 = vmul.f32 1.442695, %v202_v19  ;;  %v235_v44 = vsub.f32 1.0, %v199_v39  ;;  %v215_v49 = vmax.f32 %v107_v14, 0.0  ;;  %v219_v55 = vmul.f32 %v191_v28, %v107_v14 }
  0x96   :  { %v206_v26 = vmul.f32 1.442695, %v203_v20  ;;  %v228_v52 = vmul.f32 %v226_v40, %v226_v40  ;;  %v236_v53 = vmul.f32 0.1, %v234_v41  ;;  %v229_v56 = vmul.f32 %v227_v43, %v227_v43 }
  0x97   :  { %314 = vpow2.f32 %v204_v23  ;;  %v237_v57 = vmul.f32 0.1, %v235_v44 }
  0x98   :  { %316 = vpow2.f32 %v206_v26  ;;  %v238_v61 = vmul.f32 %v236_v53, %v228_v52 }
  0x99   :  { %v239_v63 = vmul.f32 %v237_v57, %v229_v56 }
  0x9d   :  { %v315_v29 = vpop.eup %314 }
  0x9e   :  { %v317_v30 = vpop.eup %316  ;;  %v208_v31 = vadd.f32 1.0, %v315_v29 }
  0x9f   :  { %v209_v32 = vadd.f32 1.0, %v317_v30 }
  0xa0   :  { %318 = vlog2.f32 %v208_v31 }
  0xa1   :  { %320 = vlog2.f32 %v209_v32 }
  0xa6   :  { %v319_v42 = vpop.eup %318 }
  0xa7   :  { %v321_v45 = vpop.eup %320  ;;  %v211_v46 = vmul.f32 0.6931472, %v319_v42 }
  0xa8   :  { %v213_v48 = vmul.f32 0.6931472, %v321_v45 }
  0xa9   :  { %v216_v50 = vadd.f32 %v214_v47, %v211_v46 }
  0xaa   :  { %v217_v54 = vadd.f32 %v215_v49, %v213_v48 }
  0xab   :  { %v220_v58 = vsub.f32 %v216_v50, %v218_v51 }
  0xac   :  { %v221_v59 = vsub.f32 %v217_v54, %v219_v55 }
  0xad   :  { %v232_v60 = vmul.f32 %v220_v58, %v198_v38 }
  0xae   :  { %v233_v62 = vmul.f32 %v221_v59, %v199_v39 }
  0xaf   :  { %v240_v0 = vadd.f32 %v238_v61, %v232_v60 }
  0xb0   :  { %v241_v1 = vadd.f32 %v239_v63, %v233_v62 }
  0xb2   :  { %v251_v2 = vadd.f32 %v241_v1, %v240_v0 }
  0xb4   :  { %252 = vadd.xlane.f32.xlu0 %v251_v2 }
 0x127   :  { %v253_v3 = vpop.xlane.xlu0 %252 }
 0x128   :  { %v254_v4 = vrot.slane %v253_v3, 4 }
 0x12a   :  { %v255_v5 = vadd.f32 %v254_v4, %v253_v3 }
 0x12c   :  { %v256_v6 = vrot.slane %v255_v5, 2 }
 0x12e   :  { %v257_v7 = vadd.f32 %v256_v6, %v255_v5 }
 0x130   :  { %v258_v8 = vrot.slane %v257_v7, 1 }
 0x132   :  { %v259_v9 = vadd.f32 %v258_v8, %v257_v7 }
 0x134   :  { %300 = vpush %v259_v9 }
 0x165   :  { %s301_s15 = spop %300 }
 0x166   :  { %262 = sst [smem:[#allocation3]] %s301_s15 }
 0x167   :  { %271 = dma.smem_to_hbm %s338_s16, 16, %s269_s14, [#allocation4]  }
 0x168   :  { %334 = dma.done.wait [#allocation4], 16  }
 0x169   :  { %335 = vsyncadd [#allocation4], 4294967280 }
 0x16a   :  { %276 = sfence }
 0x16b   :  { %277 = vsyncpa [#allocation4], 1 }

</bundles_post_ra>
